<compile_context>
chip_gen: v7x
topology: tpu7x:2x2x1
jax: 0.10.0
libtpu: 0.0.40
codegen_flags: <defaults>
</compile_context>

<pallas_src>
import functools

import jax
import jax.numpy as jnp
from jax import lax
from jax.experimental import pallas as pl
from jax.experimental.pallas import tpu as pltpu


def _round_up(n, m):
    return ((n + m - 1) // m) * m


def _cdiv(a, b):
    return -(-a // b)


def _vmem_capacity_bytes():
    """Physical VMEM for this generation (conservative 64 MiB fallback)."""
    try:
        info = pltpu.get_tpu_info()
        return int(getattr(info, "vmem_capacity_bytes", 64 << 20))
    except Exception:
        return 64 << 20


def _num_tensorcores():
    """TensorCores sharing one grid via dimension_semantics ('parallel')."""
    try:
        kind = jax.devices()[0].device_kind.lower()
    except Exception:
        return 1
    # v4 (megacore) and v7x expose 2 TensorCores behind one device.
    if "v4" in kind or "7" in kind:
        return 2
    return 1


def _projection_head_kernel(x_ref, w1_ref, b1_ref, w2_ref, b2_ref, o_ref):
    """One batch tile of: L2norm( relu(x @ W1 + b1) @ W2 + b2 )."""
    x = x_ref[...]                                   # native dtype -> MXU directly

    # Linear 1 + ReLU  (MXU matmul, f32 accumulate).
    h = jnp.dot(x, w1_ref[...], preferred_element_type=jnp.float32)
    h = h + b1_ref[...].astype(jnp.float32)          # [bb, hid] + [1, hid]
    h = jnp.maximum(h, 0.0)

    # Linear 2 — cast activations back to the weight dtype (no-op for f32,
    # keeps the bf16 MXU rate when weights are bf16); accumulate in f32.
    h = h.astype(w2_ref.dtype)
    y = jnp.dot(h, w2_ref[...], preferred_element_type=jnp.float32)
    y = y + b2_ref[...].astype(jnp.float32)          # [bb, out_pad] + [1, out_pad]

    # F.normalize(y, dim=1): y / max(||y||, 1e-12) == y * rsqrt(max(||y||^2, 1e-24)).
    # Padded output columns are exactly zero, so they do not perturb the norm.
    sq = jnp.sum(y * y, axis=1, keepdims=True)       # [bb, 1], f32
    inv = lax.rsqrt(jnp.maximum(sq, 1e-24))          # EUP slot, not a VPU divide
    o_ref[...] = (y * inv).astype(o_ref.dtype)


def prepare_params(w1, b1, w2, b2, *, dtype=None):
    """One-time parameter packing (hoisted out of the per-call path).

    Transposes weights to [K, N], reshapes biases to [1, N], pads out_dim up to
    a lane-dense multiple of 128 with zeros, and optionally casts (e.g. bf16).
    """
    out_dim = w2.shape[0]
    out_pad = _round_up(out_dim, 128)
    w1_t = jnp.transpose(w1)                         # [in_dim, hid_dim]
    w2_t = jnp.transpose(w2)                         # [hid_dim, out_dim]
    b1_2d = b1.reshape(1, -1)
    b2_2d = b2.reshape(1, -1)
    if out_pad != out_dim:
        w2_t = jnp.pad(w2_t, ((0, 0), (0, out_pad - out_dim)))
        b2_2d = jnp.pad(b2_2d, ((0, 0), (0, out_pad - out_dim)))
    if dtype is not None:
        w1_t, b1_2d, w2_t, b2_2d = (a.astype(dtype) for a in (w1_t, b1_2d, w2_t, b2_2d))
    return {"w1": w1_t, "b1": b1_2d, "w2": w2_t, "b2": b2_2d}


@functools.partial(jax.jit, static_argnames=("out_dim", "block_b"))
def projection_head(x, params, *, out_dim=None, block_b=512):
    """x: [B, in_dim]; params from prepare_params(); returns [B, out_dim]."""
    w1_t, b1_2d, w2_t, b2_2d = params["w1"], params["b1"], params["w2"], params["b2"]
    B, in_dim = x.shape
    hid_dim = w1_t.shape[1]
    out_pad = w2_t.shape[1]
    if out_dim is None:
        out_dim = out_pad

    # ---- TensorCore-aware batch tiling; bb is always a multiple of 128.
    min_tile = 128
    num_tc = _num_tensorcores()
    target_B = _round_up(B, min_tile)
    bb = min(_round_up(block_b, min_tile), target_B)
    if num_tc > 1:
        # Aim for >= num_tc grid steps so "parallel" sharding uses every core.
        bb = min(bb, _round_up(_cdiv(target_B, num_tc), min_tile))
    bb = max(bb, min_tile)
    padded_B = _round_up(B, bb)
    if padded_B != B:
        x = jnp.pad(x, ((0, padded_B - B), (0, 0)))
    grid = (padded_B // bb,)

    # ---- VMEM budget: pipeline double-buffers each block; weights/biases are
    # resident (constant index_map). Cap at ~85% of this generation's physical
    # VMEM so Mosaic internal scratch still fits (no full-64MiB request on v7x,
    # no artificial 64 MiB cap on 128 MiB parts).
    wb = jnp.dtype(w1_t.dtype).itemsize
    xb = jnp.dtype(x.dtype).itemsize
    weight_bytes = 2 * (in_dim * hid_dim + hid_dim * out_pad + hid_dim + out_pad) * wb
    io_bytes = 2 * bb * in_dim * xb + 2 * bb * out_pad * xb
    scratch_bytes = 4 * bb * (3 * hid_dim + 2 * out_pad)   # ~3 live f32 [bb,hid] + y temps
    vmem_cap = _vmem_capacity_bytes()
    vmem_limit = int(weight_bytes + io_bytes + scratch_bytes) + (4 << 20)
    vmem_limit = min(max(vmem_limit, 16 << 20), int(vmem_cap * 0.85))

    out = pl.pallas_call(
        _projection_head_kernel,
        out_shape=jax.ShapeDtypeStruct((padded_B, out_pad), x.dtype),
        grid_spec=pltpu.PrefetchScalarGridSpec(
            num_scalar_prefetch=0,
            grid=grid,
            in_specs=[
                # Batch tile of the input (deepen with pipeline_mode=pl.Buffered(3)
                # on v6e only if a profile shows exposed x DMA).
                pl.BlockSpec((bb, in_dim), lambda i: (i, 0)),
                # Weights / biases: full arrays, same block every step (VMEM resident).
                pl.BlockSpec((in_dim, hid_dim), lambda i: (0, 0)),
                pl.BlockSpec((1, hid_dim), lambda i: (0, 0)),
                pl.BlockSpec((hid_dim, out_pad), lambda i: (0, 0)),
                pl.BlockSpec((1, out_pad), lambda i: (0, 0)),
            ],
            out_specs=pl.BlockSpec((bb, out_pad), lambda i: (i, 0)),
        ),
        compiler_params=pltpu.CompilerParams(
            dimension_semantics=("parallel",),       # shards batch tiles across TCs
            vmem_limit_bytes=vmem_limit),
    )(x, w1_t, b1_2d, w2_t, b2_2d)
    return out[:B, :out_dim]


def _init_linear(key, out_features, in_features, dtype=jnp.float32):
    """Deterministic init mimicking nn.Linear (uniform +-1/sqrt(fan_in))."""
    kw, kb = jax.random.split(key)
    bound = 1.0 / jnp.sqrt(jnp.asarray(in_features, dtype))
    w = jax.random.uniform(kw, (out_features, in_features), dtype,
                           minval=-bound, maxval=bound)
    b = jax.random.uniform(kb, (out_features,), dtype,
                           minval=-bound, maxval=bound)
    return w, b


def _reference(x, w1, b1, w2, b2):
    h = jnp.maximum(jnp.dot(x, w1.T, precision=lax.Precision.HIGHEST) + b1, 0.0)
    y = jnp.dot(h, w2.T, precision=lax.Precision.HIGHEST) + b2
    norm = jnp.maximum(jnp.linalg.norm(y, axis=1, keepdims=True), 1e-12)
    return y / norm


if __name__ == "__main__":
    # Small shapes consistent with the module (scaled down from 512/512/128).
    # B=200 exercises the ragged-batch pad AND a 2-step grid with block_b=128;
    # out_dim=64 exercises the lane-dense output padding path.
    B, in_dim, hid_dim, out_dim = 200, 128, 128, 64

    key = jax.random.PRNGKey(0)
    kx, k1, k2 = jax.random.split(key, 3)
    x = jax.random.normal(kx, (B, in_dim), jnp.float32)
    w1, b1 = _init_linear(k1, hid_dim, in_dim)
    w2, b2 = _init_linear(k2, out_dim, hid_dim)

    ref = _reference(x, w1, b1, w2, b2)

    # f32 path.
    params = prepare_params(w1, b1, w2, b2)
    out = jax.block_until_ready(projection_head(x, params, out_dim=out_dim, block_b=128))
    assert out.shape == (B, out_dim)
    assert jnp.allclose(out, ref, atol=2e-3, rtol=2e-3), "f32 mismatch vs reference"

    # bf16 production path: params cast once at prep time, bf16 activations,
    # f32 MXU accumulation inside the kernel.
    params_bf16 = prepare_params(w1, b1, w2, b2, dtype=jnp.bfloat16)
    out_bf16 = jax.block_until_ready(
        projection_head(x.astype(jnp.bfloat16), params_bf16, out_dim=out_dim, block_b=128))
    assert out_bf16.shape == (B, out_dim)
    assert jnp.allclose(out_bf16.astype(jnp.float32), ref, atol=2e-2, rtol=2e-2), \
        "bf16 mismatch vs reference"

    print("KERNEL_OK")
</pallas_src>

<mosaic_0001>
module attributes {stable_mosaic.version = 11 : i64} {
  func.func @_projection_head_kernel(%arg0: i32, %arg1: memref<128x128xf32, #tpu.memory_space<vmem>>, %arg2: memref<128x128xf32, #tpu.memory_space<vmem>>, %arg3: memref<1x128xf32, #tpu.memory_space<vmem>>, %arg4: memref<128x128xf32, #tpu.memory_space<vmem>>, %arg5: memref<1x128xf32, #tpu.memory_space<vmem>>, %arg6: memref<128x128xf32, #tpu.memory_space<vmem>>) attributes {dimension_semantics = [#tpu.dimension_semantics<parallel>], iteration_bounds = array<i64: 2>, scalar_prefetch = 0 : i64, scratch_operands = 0 : i64, tpu.core_type = #tpu.core_type<tc>, window_params = [{transform_indices = @transform_0, window_bounds = array<i64: 128, 128>}, {pipeline_mode = #tpu.pipeline_mode<synchronous>, transform_indices = @transform_1, window_bounds = array<i64: 128, 128>}, {pipeline_mode = #tpu.pipeline_mode<synchronous>, transform_indices = @transform_2, window_bounds = array<i64: 1, 128>}, {pipeline_mode = #tpu.pipeline_mode<synchronous>, transform_indices = @transform_3, window_bounds = array<i64: 128, 128>}, {pipeline_mode = #tpu.pipeline_mode<synchronous>, transform_indices = @transform_4, window_bounds = array<i64: 1, 128>}, {transform_indices = @transform_5, window_bounds = array<i64: 128, 128>}]} {
    %c0 = arith.constant 0 : index
    %c0_0 = arith.constant 0 : index
    %0 = vector.load %arg1[%c0, %c0_0] : memref<128x128xf32, #tpu.memory_space<vmem>>, vector<128x128xf32>
    %c0_1 = arith.constant 0 : index
    %c0_2 = arith.constant 0 : index
    %1 = vector.load %arg2[%c0_1, %c0_2] : memref<128x128xf32, #tpu.memory_space<vmem>>, vector<128x128xf32>
    %cst = arith.constant dense<0.000000e+00> : vector<128x128xf32>
    %2 = tpu.matmul %0, %1, %cst {dimension_numbers = #tpu.dot_dimension_numbers<[1], [0], [0], [1], [0, 0, 1, 1], [], []>} : vector<128x128xf32>, vector<128x128xf32>, vector<128x128xf32> -> vector<128x128xf32>
    %c0_3 = arith.constant 0 : index
    %c0_4 = arith.constant 0 : index
    %3 = vector.load %arg3[%c0_3, %c0_4] : memref<1x128xf32, #tpu.memory_space<vmem>>, vector<1x128xf32>
    %4 = vector.broadcast %3 : vector<1x128xf32> to vector<128x128xf32>
    %5 = arith.addf %2, %4 : vector<128x128xf32>
    %cst_5 = arith.constant 0.000000e+00 : f32
    %6 = vector.broadcast %cst_5 : f32 to vector<128x128xf32>
    %7 = arith.maximumf %5, %6 : vector<128x128xf32>
    %c0_6 = arith.constant 0 : index
    %c0_7 = arith.constant 0 : index
    %8 = vector.load %arg4[%c0_6, %c0_7] : memref<128x128xf32, #tpu.memory_space<vmem>>, vector<128x128xf32>
    %cst_8 = arith.constant dense<0.000000e+00> : vector<128x128xf32>
    %9 = tpu.matmul %7, %8, %cst_8 {dimension_numbers = #tpu.dot_dimension_numbers<[1], [0], [0], [1], [0, 0, 1, 1], [], []>} : vector<128x128xf32>, vector<128x128xf32>, vector<128x128xf32> -> vector<128x128xf32>
    %c0_9 = arith.constant 0 : index
    %c0_10 = arith.constant 0 : index
    %10 = vector.load %arg5[%c0_9, %c0_10] : memref<1x128xf32, #tpu.memory_space<vmem>>, vector<1x128xf32>
    %11 = vector.broadcast %10 : vector<1x128xf32> to vector<128x128xf32>
    %12 = arith.addf %9, %11 : vector<128x128xf32>
    %13 = arith.mulf %12, %12 : vector<128x128xf32>
    %cst_11 = arith.constant dense<0.000000e+00> : vector<128xf32>
    %14 = vector.multi_reduction <add>, %13, %cst_11 [1] : vector<128x128xf32> to vector<128xf32>
    %15 = vector.shape_cast %14 : vector<128xf32> to vector<128x1xf32>
    %cst_12 = arith.constant 1.000000e-24 : f32
    %16 = vector.broadcast %cst_12 : f32 to vector<128x1xf32>
    %17 = arith.maximumf %15, %16 : vector<128x1xf32>
    %18 = math.rsqrt %17 : vector<128x1xf32>
    %19 = vector.broadcast %18 : vector<128x1xf32> to vector<128x128xf32>
    %20 = arith.mulf %12, %19 : vector<128x128xf32>
    %c0_13 = arith.constant 0 : index
    %c0_14 = arith.constant 0 : index
    %21 = vector.load %arg6[%c0_13, %c0_14] : memref<128x128xf32, #tpu.memory_space<vmem>>, vector<128x128xf32>
    tpu.vector_store %arg6[%c0_13, %c0_14], %20 {strides = array<i32>} : memref<128x128xf32, #tpu.memory_space<vmem>>, vector<128x128xf32>,
    return
  }
  func.func @transform_0(%arg0: i32) -> (i32, i32) {
    %c0_i32 = arith.constant 0 : i32
    %c0_i32_0 = arith.constant 0 : i32
    return %arg0, %c0_i32 : i32, i32
  }
  func.func @transform_1(%arg0: i32) -> (i32, i32) {
    %c0_i32 = arith.constant 0 : i32
    %c0_i32_0 = arith.constant 0 : i32
    %c0_i32_1 = arith.constant 0 : i32
    return %c0_i32, %c0_i32_0 : i32, i32
  }
  func.func @transform_2(%arg0: i32) -> (i32, i32) {
    %c0_i32 = arith.constant 0 : i32
    %c0_i32_0 = arith.constant 0 : i32
    %c0_i32_1 = arith.constant 0 : i32
    return %c0_i32, %c0_i32_0 : i32, i32
  }
  func.func @transform_3(%arg0: i32) -> (i32, i32) {
    %c0_i32 = arith.constant 0 : i32
    %c0_i32_0 = arith.constant 0 : i32
    %c0_i32_1 = arith.constant 0 : i32
    return %c0_i32, %c0_i32_0 : i32, i32
  }
  func.func @transform_4(%arg0: i32) -> (i32, i32) {
    %c0_i32 = arith.constant 0 : i32
    %c0_i32_0 = arith.constant 0 : i32
    %c0_i32_1 = arith.constant 0 : i32
    return %c0_i32, %c0_i32_0 : i32, i32
  }
  func.func @transform_5(%arg0: i32) -> (i32, i32) {
    %c0_i32 = arith.constant 0 : i32
    %c0_i32_0 = arith.constant 0 : i32
    return %arg0, %c0_i32 : i32, i32
  }
}

</mosaic_0001>

<bundles_post_ra>
// kernel: projection_head.1
= control target key start
LH: loop header
LB: loop body
LE: loop exit
PB: predicated region body
PF: predicated region fallthrough
CT: control target
= control target key end

     0   :  { %s1095_s18 = smov 0   ;;  %s1337_s0 = inlined_call_operand.vmem [shape: f32[256,128], index: 0, kind: input, shape index: {}]   ;;  %s1338_s1 = inlined_call_operand.vmem [shape: f32[128,128], index: 1, kind: input, shape index: {}]   ;;  %s1339_s2 = inlined_call_operand.vmem [shape: f32[1,128], index: 2, kind: input, shape index: {}]   ;;  %s1340_s3 = inlined_call_operand.vmem [shape: f32[128,128], index: 3, kind: input, shape index: {}]   ;;  %s1341_s4 = inlined_call_operand.vmem [shape: f32[1,128], index: 4, kind: input, shape index: {}]   ;;  %s1342_s5 = inlined_call_operand.vmem [shape: f32[256,128], index: 5, kind: output, shape index: {}]  }
   0x1 LB: > { %s764_s19 = sadd.s32 4294967295, %s1063_s18   ;;  %p768_p0 = scmp.ge.s32.totalorder %s1063_s18, 1  ;;  %s1063_s18 = sphi %s1095_s18, %s15_s18  }
   0x2   : > { %p188_p1 = scmp.lt.s32.totalorder %s1063_s18, 3 }
   0x4   : > { %p189_p2 = pnand %p768_p0, %p188_p1 }
   0x5   : > { %v244_v0 = vld [vmem:[%s1338_s1] sm:$0xff] (!%p189_p2)  ;;  %v245_v1 = vld [vmem:[%s1338_s1 + $0x8] sm:$0xff] (!%p189_p2)  ;;  %v246_v2 = vld [vmem:[%s1338_s1 + $0x10] sm:$0xff] (!%p189_p2)  ;;  %s769_s26 = sshll.u32 (!%p189_p2), %s764_s19, 4 }
   0x6   : > { %192 = sbr.rel (%p189_p2) target bundleno = 664 (0x298), region = 40  ;;  %v953_v3 = vpack.c.bf16 (!%p189_p2), %v245_v1, %v244_v0  ;;  %v247_v4 = vld [vmem:[%s1338_s1 + $0x18] sm:$0xff] (!%p189_p2)  ;;  %p217_p3 = scmp.lt.s32.totalorder (!%p189_p2), %s769_s26, 31  ;;  %v248_v6 = vld [vmem:[%s1338_s1 + $0x20] sm:$0xff] (!%p189_p2)  ;;  %v249_v7 = vld [vmem:[%s1338_s1 + $0x28] sm:$0xff] (!%p189_p2) }
   0x7   : > { %v957_v5 = vpack.c.bf16 (!%p189_p2), %v247_v4, %v246_v2  ;;  %v961_v8 = vpack.c.bf16 (!%p189_p2), %v249_v7, %v248_v6  ;;  %v250_v9 = vld [vmem:[%s1338_s1 + $0x30] sm:$0xff] (!%p189_p2)  ;;  %v428_v10 = vld [vmem:[%s1340_s3] sm:$0xff] (!%p189_p2)  ;;  %v429_v11 = vld [vmem:[%s1340_s3 + $0x8] sm:$0xff] (!%p189_p2) }
   0x8   : > { %954 = vmatprep.subr.bf16.mxu0 (!%p189_p2), %v953_v3  ;;  %v251_v12 = vld [vmem:[%s1338_s1 + $0x38] sm:$0xff] (!%p189_p2)  ;;  %v985_v13 = vpack.c.bf16 (!%p189_p2), %v429_v11, %v428_v10  ;;  %v430_v14 = vld [vmem:[%s1340_s3 + $0x10] sm:$0xff] (!%p189_p2)  ;;  %v252_v19 = vld [vmem:[%s1338_s1 + $0x40] sm:$0xff] (!%p189_p2) }
   0x9   : > { %956 = vmatpush3.bf16.msra.mxu0 (!%p189_p2), %v953_v3  ;;  %v431_v15 = vld [vmem:[%s1340_s3 + $0x18] sm:$0xff] (!%p189_p2)  ;;  %v965_v18 = vpack.c.bf16 (!%p189_p2), %v251_v12, %v250_v9  ;;  %v253_v20 = vld [vmem:[%s1338_s1 + $0x48] sm:$0xff] (!%p189_p2)  ;;  %v432_v21 = vld [vmem:[%s1340_s3 + $0x20] sm:$0xff] (!%p189_p2) }
   0xa   : > { %958 = vmatprep.subr.bf16.mxu0 (!%p189_p2), %v957_v5  ;;  %v989_v17 = vpack.c.bf16 (!%p189_p2), %v431_v15, %v430_v14  ;;  %986 = vmatprep.subr.bf16.mxu1 (!%p189_p2), %v985_v13  ;;  %v433_v22 = vld [vmem:[%s1340_s3 + $0x28] sm:$0xff] (!%p189_p2)  ;;  %v434_v23 = vld [vmem:[%s1340_s3 + $0x30] sm:$0xff] (!%p189_p2)  ;;  %v969_v24 = vpack.c.bf16 (!%p189_p2), %v253_v20, %v252_v19  ;;  %v435_v26 = vld [vmem:[%s1340_s3 + $0x38] sm:$0xff] (!%p189_p2) }
   0xb   : > { %988 = vmatpush3.bf16.msra.mxu1 (!%p189_p2), %v985_v13  ;;  %v993_v25 = vpack.c.bf16 (!%p189_p2), %v433_v22, %v432_v21  ;;  %v254_v27 = vld [vmem:[%s1338_s1 + $0x50] sm:$0xff] (!%p189_p2)  ;;  %v255_v28 = vld [vmem:[%s1338_s1 + $0x58] sm:$0xff] (!%p189_p2)  ;;  %v997_v29 = vpack.c.bf16 (!%p189_p2), %v435_v26, %v434_v23  ;;  %v436_v30 = vld [vmem:[%s1340_s3 + $0x40] sm:$0xff] (!%p189_p2) }
   0xc   : > { %990 = vmatprep.subr.bf16.mxu1 (!%p189_p2), %v989_v17  ;;  %v437_v31 = vld [vmem:[%s1340_s3 + $0x48] sm:$0xff] (!%p189_p2)  ;;  %v973_v32 = vpack.c.bf16 (!%p189_p2), %v255_v28, %v254_v27  ;;  %v256_v33 = vld [vmem:[%s1338_s1 + $0x60] sm:$0xff] (!%p189_p2)  ;;  %v438_v36 = vld [vmem:[%s1340_s3 + $0x50] sm:$0xff] (!%p189_p2) }
   0xd   : > { %s1344_s26 = smov (!%p217_p3, %s769_s26), 31  ;;  %960 = vmatpush3.bf16.msra.mxu0 %v957_v5  ;;  %v257_v34 = vld [vmem:[%s1338_s1 + $0x68] sm:$0xff]  ;;  %v1001_v35 = vpack.c.bf16 %v437_v31, %v436_v30  ;;  %v439_v37 = vld [vmem:[%s1340_s3 + $0x58] sm:$0xff]  ;;  %v258_v39 = vld [vmem:[%s1338_s1 + $0x70] sm:$0xff] }
   0xe   : > { %s770_s10 = sshll.u32 %s1344_s26, 3  ;;  %962 = vmatprep.subr.bf16.mxu0 %v961_v8  ;;  %v977_v38 = vpack.c.bf16 %v257_v34, %v256_v33  ;;  %v259_v40 = vld [vmem:[%s1338_s1 + $0x78] sm:$0xff]  ;;  %v1005_v41 = vpack.c.bf16 %v439_v37, %v438_v36  ;;  %v440_v42 = vld [vmem:[%s1340_s3 + $0x60] sm:$0xff]  ;;  %v441_v43 = vld [vmem:[%s1340_s3 + $0x68] sm:$0xff] }
   0xf   : > { %s1141_s20 = scalar_lea.vmem %s1337_s0, %s770_s10  ;;  %992 = vmatpush3.bf16.msra.mxu1 %v989_v17  ;;  %v981_v44 = vpack.c.bf16 %v259_v40, %v258_v39  ;;  %v1009_v45 = vpack.c.bf16 %v441_v43, %v440_v42  ;;  %v442_v61 = vld [vmem:[%s1340_s3 + $0x70] sm:$0xff]  ;;  %v443_v62 = vld [vmem:[%s1340_s3 + $0x78] sm:$0xff]  ;;  %v773_v0 = vld [vmem:[%s1339_s2] ss:$0 sm:$0xff]  ;;  %s1300_s29 = scalar_lea.vmem %s1342_s5, %s770_s10 }
  0x10   : > { %v228_v16 = vld [vmem:[%s1141_s20] sm:$0xff]  ;;  %994 = vmatprep.subr.bf16.mxu1 %v993_v25  ;;  %v229_v46 = vld [vmem:[%s1141_s20 + $0x8] sm:$0xff]  ;;  %v230_v47 = vld [vmem:[%s1141_s20 + $0x10] sm:$0xff]  ;;  %v1013_v63 = vpack.c.bf16 %v443_v62, %v442_v61 }
  0x11   : > { %873 = vmatprep.mubr.f32.mxu0 %v228_v16  ;;  %964 = vmatpush3.bf16.msra.mxu0 %v961_v8  ;;  %v231_v48 = vld [vmem:[%s1141_s20 + $0x18] sm:$0xff]  ;;  %v232_v49 = vld [vmem:[%s1141_s20 + $0x20] sm:$0xff]  ;;  %v233_v50 = vld [vmem:[%s1141_s20 + $0x28] sm:$0xff] }
  0x12   : > { %966 = vmatprep.subr.bf16.mxu0 %v965_v18  ;;  %v234_v51 = vld [vmem:[%s1141_s20 + $0x30] sm:$0xff]  ;;  %v235_v52 = vld [vmem:[%s1141_s20 + $0x38] sm:$0xff]  ;;  %v236_v53 = vld [vmem:[%s1141_s20 + $0x40] sm:$0xff] }
  0x13   : > { %996 = vmatpush3.bf16.msra.mxu1 %v993_v25  ;;  %v237_v54 = vld [vmem:[%s1141_s20 + $0x48] sm:$0xff]  ;;  %v238_v55 = vld [vmem:[%s1141_s20 + $0x50] sm:$0xff]  ;;  %v239_v56 = vld [vmem:[%s1141_s20 + $0x58] sm:$0xff] }
  0x14   : > { %998 = vmatprep.subr.bf16.mxu1 %v997_v29  ;;  %v240_v57 = vld [vmem:[%s1141_s20 + $0x60] sm:$0xff]  ;;  %v241_v58 = vld [vmem:[%s1141_s20 + $0x68] sm:$0xff]  ;;  %v242_v59 = vld [vmem:[%s1141_s20 + $0x70] sm:$0xff] }
  0x15   : > { %968 = vmatpush3.bf16.msra.mxu0 %v965_v18  ;;  %v243_v60 = vld [vmem:[%s1141_s20 + $0x78] sm:$0xff] }
  0x16   : > { %970 = vmatprep.subr.bf16.mxu0 %v969_v24 }
  0x17   : > { %1000 = vmatpush3.bf16.msra.mxu1 %v997_v29 }
  0x18   : > { %1002 = vmatprep.subr.bf16.mxu1 %v1001_v35 }
  0x19   : > { %972 = vmatpush3.bf16.msra.mxu0 %v969_v24 }
  0x1a   : > { %974 = vmatprep.subr.bf16.mxu0 %v973_v32 }
  0x1b   : > { %1004 = vmatpush3.bf16.msra.mxu1 %v1001_v35 }
  0x1c   : > { %1006 = vmatprep.subr.bf16.mxu1 %v1005_v41 }
  0x1d   : > { %976 = vmatpush3.bf16.msra.mxu0 %v973_v32 }
  0x1e   : > { %978 = vmatprep.subr.bf16.mxu0 %v977_v38 }
  0x1f   : > { %1008 = vmatpush3.bf16.msra.mxu1 %v1005_v41 }
  0x20   : > { %1010 = vmatprep.subr.bf16.mxu1 %v1009_v45 }
  0x21   : > { %980 = vmatpush3.bf16.msra.mxu0 %v977_v38 }
  0x22   : > { %982 = vmatprep.subr.bf16.mxu0 %v981_v44 }
  0x23   : > { %1012 = vmatpush3.bf16.msra.mxu1 %v1009_v45 }
  0x24   : > { %1014 = vmatprep.subr.bf16.mxu1 %v1013_v63 }
  0x25   : > { %984 = vmatpush3.bf16.msra.mxu0 %v981_v44 }
  0x27   : > { %1016 = vmatpush3.bf16.msra.mxu1 %v1013_v63 }
  0x28   : > { %874 = vmatmul.mubr.f32.vlgmr.msra.gmra.mrb[0].mxu0 %v229_v46 }
  0x29   : > { %876 = vmatprep.mubr.f32.mxu0 %v230_v47 }
  0x2c   : > { %877 = vmatmul.mubr.f32.gmra.mrb[2].mxu0 %v231_v48 }
  0x2d   : > { %879 = vmatprep.mubr.f32.mxu0 %v232_v49  ;;  %v774_v49 = vld [vmem:[%s1341_s4] ss:$0 sm:$0xff] }
  0x30   : > { %880 = vmatmul.mubr.f32.gmra.mrb[4].mxu0 %v233_v50 }
  0x31   : > { %882 = vmatprep.mubr.f32.mxu0 %v234_v51 }
  0x34   : > { %883 = vmatmul.mubr.f32.gmra.mrb[6].mxu0 %v235_v52 }
  0x35   : > { %885 = vmatprep.mubr.f32.mxu0 %v236_v53 }
  0x38   : > { %886 = vmatmul.mubr.f32.gmra.mrb[8].mxu0 %v237_v54 }
  0x39   : > { %888 = vmatprep.mubr.f32.mxu0 %v238_v55 }
  0x3c   : > { %889 = vmatmul.mubr.f32.gmra.mrb[10].mxu0 %v239_v56 }
  0x3d   : > { %891 = vmatprep.mubr.f32.mxu0 %v240_v57 }
  0x40   : > { %892 = vmatmul.mubr.f32.gmra.mrb[12].mxu0 %v241_v58 }
  0x41   : > { %894 = vmatprep.mubr.f32.mxu0 %v242_v59 }
  0x44   : > { %895 = vmatmul.mubr.f32.gmra.mrb[14].mxu0 %v243_v60 }
  0xfb   : > { %v875_v1 = vpop.f32.mrb[0].mxu0 }
  0xfc   : > { %v339_v2 = vadd.f32 %v875_v1, %v773_v0  ;;  %v333_v3 = vpop.f32.mrb[1].mxu0 }
  0xfd   : > { %v334_v4 = vadd.f32 %v773_v0, %v333_v3 }
  0xfe   : > { %v413_v7 = vmax.f32 %v339_v2, 0.0 }
  0xff   : > { %v878_v5 = vpop.f32.mrb[2].mxu0  ;;  %v412_v6 = vmax.f32 %v334_v4, 0.0 }
 0x100   : > { %v349_v8 = vadd.f32 %v878_v5, %v773_v0  ;;  %v343_v9 = vpop.f32.mrb[3].mxu0 }
 0x101   : > { %v344_v10 = vadd.f32 %v773_v0, %v343_v9  ;;  %929 = vmatprep.mubr.f32.mxu1 %v412_v6 }
 0x102   : > { %930 = vmatmul.mubr.f32.vlgmr.msra.gmra.mrb[0].mxu1 %v413_v7  ;;  %v415_v13 = vmax.f32 %v349_v8, 0.0 }
 0x103   : > { %v414_v11 = vmax.f32 %v344_v10, 0.0  ;;  %v881_v12 = vpop.f32.mrb[4].mxu0 }
 0x104   : > { %v359_v14 = vadd.f32 %v881_v12, %v773_v0  ;;  %v353_v15 = vpop.f32.mrb[5].mxu0 }
 0x105   : > { %v354_v16 = vadd.f32 %v773_v0, %v353_v15  ;;  %932 = vmatprep.mubr.f32.mxu1 %v414_v11 }
 0x106   : > { %v417_v17 = vmax.f32 %v359_v14, 0.0  ;;  %933 = vmatmul.mubr.f32.gmra.mrb[2].mxu1 %v415_v13 }
 0x107   : > { %v416_v18 = vmax.f32 %v354_v16, 0.0  ;;  %v884_v19 = vpop.f32.mrb[6].mxu0 }
 0x108   : > { %v369_v20 = vadd.f32 %v884_v19, %v773_v0  ;;  %v363_v21 = vpop.f32.mrb[7].mxu0 }
 0x109   : > { %v364_v22 = vadd.f32 %v773_v0, %v363_v21  ;;  %935 = vmatprep.mubr.f32.mxu1 %v416_v18 }
 0x10a   : > { %v419_v23 = vmax.f32 %v369_v20, 0.0  ;;  %936 = vmatmul.mubr.f32.gmra.mrb[4].mxu1 %v417_v17 }
 0x10b   : > { %v418_v24 = vmax.f32 %v364_v22, 0.0  ;;  %v887_v25 = vpop.f32.mrb[8].mxu0 }
 0x10c   : > { %v379_v26 = vadd.f32 %v887_v25, %v773_v0  ;;  %v373_v27 = vpop.f32.mrb[9].mxu0 }
 0x10d   : > { %v374_v28 = vadd.f32 %v773_v0, %v373_v27  ;;  %938 = vmatprep.mubr.f32.mxu1 %v418_v24 }
 0x10e   : > { %v421_v29 = vmax.f32 %v379_v26, 0.0  ;;  %939 = vmatmul.mubr.f32.gmra.mrb[6].mxu1 %v419_v23 }
 0x10f   : > { %v420_v30 = vmax.f32 %v374_v28, 0.0  ;;  %v890_v31 = vpop.f32.mrb[10].mxu0 }
 0x110   : > { %v389_v32 = vadd.f32 %v890_v31, %v773_v0  ;;  %v383_v33 = vpop.f32.mrb[11].mxu0 }
 0x111   : > { %v384_v34 = vadd.f32 %v773_v0, %v383_v33  ;;  %941 = vmatprep.mubr.f32.mxu1 %v420_v30 }
 0x112   : > { %v423_v35 = vmax.f32 %v389_v32, 0.0  ;;  %942 = vmatmul.mubr.f32.gmra.mrb[8].mxu1 %v421_v29 }
 0x113   : > { %v422_v36 = vmax.f32 %v384_v34, 0.0  ;;  %v893_v37 = vpop.f32.mrb[12].mxu0 }
 0x114   : > { %v399_v38 = vadd.f32 %v893_v37, %v773_v0  ;;  %v393_v39 = vpop.f32.mrb[13].mxu0 }
 0x115   : > { %v394_v40 = vadd.f32 %v773_v0, %v393_v39  ;;  %944 = vmatprep.mubr.f32.mxu1 %v422_v36 }
 0x116   : > { %v425_v41 = vmax.f32 %v399_v38, 0.0  ;;  %945 = vmatmul.mubr.f32.gmra.mrb[10].mxu1 %v423_v35 }
 0x117   : > { %v424_v42 = vmax.f32 %v394_v40, 0.0  ;;  %v896_v43 = vpop.f32.mrb[14].mxu0 }
 0x118   : > { %v409_v44 = vadd.f32 %v896_v43, %v773_v0  ;;  %v403_v45 = vpop.f32.mrb[15].mxu0 }
 0x119   : > { %v404_v46 = vadd.f32 %v773_v0, %v403_v45  ;;  %947 = vmatprep.mubr.f32.mxu1 %v424_v42 }
 0x11a   : > { %v427_v47 = vmax.f32 %v409_v44, 0.0  ;;  %948 = vmatmul.mubr.f32.gmra.mrb[12].mxu1 %v425_v41 }
 0x11b   : > { %v426_v48 = vmax.f32 %v404_v46, 0.0 }
 0x11d   : > { %950 = vmatprep.mubr.f32.mxu1 %v426_v48 }
 0x11e   : > { %951 = vmatmul.mubr.f32.gmra.mrb[14].mxu1 %v427_v47 }
 0x1d5   : > { %v931_v50 = vpop.f32.mrb[0].mxu1 }
 0x1d6   : > { %v1231_v51 = vadd.f32 %v931_v50, %v774_v49  ;;  %v517_v52 = vpop.f32.mrb[1].mxu1 }
 0x1d7   : > { %v1233_v53 = vadd.f32 %v774_v49, %v517_v52 }
 0x1d8   : > { %v597_v54 = vmul.f32 %v1231_v51, %v1231_v51 }
 0x1d9   : > { %v934_v55 = vpop.f32.mrb[2].mxu1  ;;  %v596_v60 = vmul.f32 %v1233_v53, %v1233_v53 }
 0x1da   : > { %v1237_v56 = vadd.f32 %v934_v55, %v774_v49  ;;  %614 = vadd.xlane.f32.xlu0 %v597_v54  ;;  %v527_v57 = vpop.f32.mrb[3].mxu1 }
 0x1db   : > { %v1239_v58 = vadd.f32 %v774_v49, %v527_v57 }
 0x1dc   : > { %v599_v59 = vmul.f32 %v1237_v56, %v1237_v56 }
 0x1dd   : > { %v937_v61 = vpop.f32.mrb[4].mxu1  ;;  %v598_v1 = vmul.f32 %v1239_v58, %v1239_v58 }
 0x1de   : > { %618 = vadd.xlane.f32.xlu1 %v599_v59  ;;  %v537_v62 = vpop.f32.mrb[5].mxu1  ;;  %612 = vadd.xlane.f32.xlu0 %v596_v60  ;;  %v1247_v0 = vadd.f32 %v937_v61, %v774_v49 }
 0x1df   : > { %v1245_v63 = vadd.f32 %v774_v49, %v537_v62 }
 0x1e0   : > { %v601_v7 = vmul.f32 %v1247_v0, %v1247_v0 }
 0x1e1   : > { %v940_v2 = vpop.f32.mrb[6].mxu1  ;;  %v600_v3 = vmul.f32 %v1245_v63, %v1245_v63 }
 0x1e2   : > { %v547_v4 = vpop.f32.mrb[7].mxu1  ;;  %616 = vadd.xlane.f32.xlu1 %v598_v1  ;;  %v1255_v6 = vadd.f32 %v940_v2, %v774_v49 }
 0x1e3   : > { %v1253_v5 = vadd.f32 %v774_v49, %v547_v4  ;;  %620 = vadd.xlane.f32.xlu0 %v600_v3 }
 0x1e4   : > { %v603_v13 = vmul.f32 %v1255_v6, %v1255_v6 }
 0x1e5   : > { %v943_v8 = vpop.f32.mrb[8].mxu1  ;;  %v602_v9 = vmul.f32 %v1253_v5, %v1253_v5 }
 0x1e6   : > { %v557_v10 = vpop.f32.mrb[9].mxu1  ;;  %622 = vadd.xlane.f32.xlu1 %v601_v7  ;;  %v1263_v12 = vadd.f32 %v943_v8, %v774_v49 }
 0x1e7   : > { %v1261_v11 = vadd.f32 %v774_v49, %v557_v10  ;;  %624 = vadd.xlane.f32.xlu0 %v602_v9 }
 0x1e8   : > { %v605_v19 = vmul.f32 %v1263_v12, %v1263_v12 }
 0x1e9   : > { %v946_v14 = vpop.f32.mrb[10].mxu1  ;;  %v604_v15 = vmul.f32 %v1261_v11, %v1261_v11 }
 0x1ea   : > { %v567_v16 = vpop.f32.mrb[11].mxu1  ;;  %626 = vadd.xlane.f32.xlu1 %v603_v13  ;;  %v1271_v18 = vadd.f32 %v946_v14, %v774_v49 }
 0x1eb   : > { %v1269_v17 = vadd.f32 %v774_v49, %v567_v16  ;;  %628 = vadd.xlane.f32.xlu0 %v604_v15 }
 0x1ec   : > { %v607_v25 = vmul.f32 %v1271_v18, %v1271_v18 }
 0x1ed   : > { %v949_v20 = vpop.f32.mrb[12].mxu1  ;;  %v606_v21 = vmul.f32 %v1269_v17, %v1269_v17 }
 0x1ee   : > { %v577_v22 = vpop.f32.mrb[13].mxu1  ;;  %630 = vadd.xlane.f32.xlu1 %v605_v19  ;;  %v1279_v24 = vadd.f32 %v949_v20, %v774_v49 }
 0x1ef   : > { %v1277_v23 = vadd.f32 %v774_v49, %v577_v22  ;;  %632 = vadd.xlane.f32.xlu0 %v606_v21 }
 0x1f0   : > { %v609_v31 = vmul.f32 %v1279_v24, %v1279_v24 }
 0x1f1   : > { %v952_v26 = vpop.f32.mrb[14].mxu1  ;;  %v608_v27 = vmul.f32 %v1277_v23, %v1277_v23 }
 0x1f2   : > { %v587_v28 = vpop.f32.mrb[15].mxu1  ;;  %634 = vadd.xlane.f32.xlu1 %v607_v25  ;;  %v1287_v30 = vadd.f32 %v952_v26, %v774_v49 }
 0x1f3   : > { %v1285_v29 = vadd.f32 %v774_v49, %v587_v28  ;;  %636 = vadd.xlane.f32.xlu0 %v608_v27 }
 0x1f4   : > { %v611_v33 = vmul.f32 %v1287_v30, %v1287_v30 }
 0x1f5   : > { %v610_v32 = vmul.f32 %v1285_v29, %v1285_v29 }
 0x1f6   : > { %638 = vadd.xlane.f32.xlu1 %v609_v31 }
 0x1f7   : > { %640 = vadd.xlane.f32.xlu0 %v610_v32 }
 0x1fa   : > { %642 = vadd.xlane.f32.xlu1 %v611_v33 }
 0x267   : > { %v615_v34 = vpop.xlane.xlu0 %614 }
 0x268   : > { %v645_v35 = vmax.f32 %v615_v34, 1e-24 }
 0x26a   : > { %1025 = vrsqrt.f32 %v645_v35 }
 0x26b   : > { %v619_v36 = vpop.xlane.xlu1 %618  ;;  %v613_v37 = vpop.xlane.xlu0 %612 }
 0x26c   : > { %v647_v38 = vmax.f32 %v619_v36, 1e-24  ;;  %v644_v39 = vmax.f32 %v613_v37, 1e-24 }
 0x26e   : > { %1027 = vrsqrt.f32 %v647_v38 }
 0x26f   : > { %1029 = vrsqrt.f32 %v644_v39  ;;  %v617_v40 = vpop.xlane.xlu1 %616 }
 0x270   : > { %v646_v41 = vmax.f32 %v617_v40, 1e-24  ;;  %v621_v42 = vpop.xlane.xlu0 %620 }
 0x271   : > { %v648_v43 = vmax.f32 %v621_v42, 1e-24 }
 0x272   : > { %1031 = vrsqrt.f32 %v646_v41 }
 0x273   : > { %1033 = vrsqrt.f32 %v648_v43  ;;  %v623_v44 = vpop.xlane.xlu1 %622 }
 0x274   : > { %v1026_v45 = vpop.eup %1025  ;;  %v649_v46 = vmax.f32 %v623_v44, 1e-24  ;;  %v625_v47 = vpop.xlane.xlu0 %624 }
 0x275   : > { %v677_v48 = vmul.f32 %v1026_v45, %v1231_v51  ;;  %v650_v49 = vmax.f32 %v625_v47, 1e-24 }
 0x276   : > { %1035 = vrsqrt.f32 %v649_v46 }
 0x277   : > { %693 = vst [vmem:[%s1300_s29 + $0x8] sm:$0xff] %v677_v48  ;;  %1037 = vrsqrt.f32 %v650_v49  ;;  %v627_v50 = vpop.xlane.xlu1 %626 }
 0x278   : > { %v1028_v52 = vpop.eup %1027  ;;  %v651_v54 = vmax.f32 %v627_v50, 1e-24  ;;  %v629_v55 = vpop.xlane.xlu0 %628 }
 0x279   : > { %v1030_v57 = vpop.eup %1029  ;;  %v679_v59 = vmul.f32 %v1028_v52, %v1237_v56  ;;  %v652_v60 = vmax.f32 %v629_v55, 1e-24 }
 0x27a   : > { %v676_v61 = vmul.f32 %v1030_v57, %v1233_v53  ;;  %1039 = vrsqrt.f32 %v651_v54 }
 0x27b   : > { %695 = vst [vmem:[%s1300_s29 + $0x18] sm:$0xff] %v679_v59  ;;  %1041 = vrsqrt.f32 %v652_v60  ;;  %v631_v51 = vpop.xlane.xlu1 %630 }
 0x27c   : > { %v1032_v62 = vpop.eup %1031  ;;  %692 = vst [vmem:[%s1300_s29] sm:$0xff] %v676_v61  ;;  %v653_v1 = vmax.f32 %v631_v51, 1e-24  ;;  %v633_v2 = vpop.xlane.xlu0 %632 }
 0x27d   : > { %v1034_v3 = vpop.eup %1033  ;;  %v678_v4 = vmul.f32 %v1032_v62, %v1239_v58  ;;  %v654_v7 = vmax.f32 %v633_v2, 1e-24 }
 0x27e   : > { %v680_v56 = vmul.f32 %v1034_v3, %v1245_v63  ;;  %1043 = vrsqrt.f32 %v653_v1 }
 0x27f   : > { %694 = vst [vmem:[%s1300_s29 + $0x10] sm:$0xff] %v678_v4  ;;  %1045 = vrsqrt.f32 %v654_v7  ;;  %v635_v53 = vpop.xlane.xlu1 %634 }
 0x280   : > { %v1036_v8 = vpop.eup %1035  ;;  %696 = vst [vmem:[%s1300_s29 + $0x20] sm:$0xff] %v680_v56  ;;  %v655_v9 = vmax.f32 %v635_v53, 1e-24  ;;  %v637_v10 = vpop.xlane.xlu0 %636 }
 0x281   : > { %v1038_v13 = vpop.eup %1037  ;;  %v681_v14 = vmul.f32 %v1036_v8, %v1247_v0  ;;  %v656_v15 = vmax.f32 %v637_v10, 1e-24 }
 0x282   : > { %v682_v58 = vmul.f32 %v1038_v13, %v1253_v5  ;;  %1047 = vrsqrt.f32 %v655_v9 }
 0x283   : > { %697 = vst [vmem:[%s1300_s29 + $0x28] sm:$0xff] %v681_v14  ;;  %1049 = vrsqrt.f32 %v656_v15  ;;  %v639_v63 = vpop.xlane.xlu1 %638 }
 0x284   : > { %v1040_v16 = vpop.eup %1039  ;;  %698 = vst [vmem:[%s1300_s29 + $0x30] sm:$0xff] %v682_v58  ;;  %v657_v19 = vmax.f32 %v639_v63, 1e-24  ;;  %v641_v20 = vpop.xlane.xlu0 %640 }
 0x285   : > { %v1042_v21 = vpop.eup %1041  ;;  %v683_v22 = vmul.f32 %v1040_v16, %v1255_v6  ;;  %v658_v25 = vmax.f32 %v641_v20, 1e-24 }
 0x286   : > { %v684_v0 = vmul.f32 %v1042_v21, %v1261_v11  ;;  %1051 = vrsqrt.f32 %v657_v19 }
 0x287   : > { %699 = vst [vmem:[%s1300_s29 + $0x38] sm:$0xff] %v683_v22  ;;  %1053 = vrsqrt.f32 %v658_v25  ;;  %v643_v5 = vpop.xlane.xlu1 %642 }
 0x288   : > { %v1044_v26 = vpop.eup %1043  ;;  %700 = vst [vmem:[%s1300_s29 + $0x40] sm:$0xff] %v684_v0  ;;  %v659_v27 = vmax.f32 %v643_v5, 1e-24 }
 0x289   : > { %v1046_v28 = vpop.eup %1045  ;;  %v685_v31 = vmul.f32 %v1044_v26, %v1263_v12 }
 0x28a   : > { %v686_v32 = vmul.f32 %v1046_v28, %v1269_v17  ;;  %1055 = vrsqrt.f32 %v659_v27 }
 0x28b   : > { %701 = vst [vmem:[%s1300_s29 + $0x48] sm:$0xff] %v685_v31 }
 0x28c   : > { %v1048_v6 = vpop.eup %1047  ;;  %702 = vst [vmem:[%s1300_s29 + $0x50] sm:$0xff] %v686_v32 }
 0x28d   : > { %v1050_v11 = vpop.eup %1049  ;;  %v687_v33 = vmul.f32 %v1048_v6, %v1271_v18 }
 0x28e   : > { %v688_v34 = vmul.f32 %v1050_v11, %v1277_v23 }
 0x28f   : > { %703 = vst [vmem:[%s1300_s29 + $0x58] sm:$0xff] %v687_v33 }
 0x290   : > { %v1052_v35 = vpop.eup %1051  ;;  %704 = vst [vmem:[%s1300_s29 + $0x60] sm:$0xff] %v688_v34 }
 0x291   : > { %v1054_v36 = vpop.eup %1053  ;;  %v689_v37 = vmul.f32 %v1052_v35, %v1279_v24 }
 0x292   : > { %v690_v12 = vmul.f32 %v1054_v36, %v1285_v29 }
 0x293   : > { %705 = vst [vmem:[%s1300_s29 + $0x68] sm:$0xff] %v689_v37 }
 0x294   : > { %v1056_v17 = vpop.eup %1055  ;;  %706 = vst [vmem:[%s1300_s29 + $0x70] sm:$0xff] %v690_v12 }
 0x295   : > { %v691_v38 = vmul.f32 %v1056_v17, %v1287_v30 }
 0x297   : > { %707 = vst [vmem:[%s1300_s29 + $0x78] sm:$0xff] %v691_v38 }
 0x298 PF: > { %s15_s18 = sadd.s32 1, %s1063_s18  }
 0x299   : > { %p12_p4 = scmp.ge.s32.totalorder %s15_s18, 4  }
 0x29b   :  { %14 = sbr.rel (!%p12_p4) target bundleno = 1 (0x1), region = 70 }

</bundles_post_ra>
